<compile_context>
chip_gen: v5e
topology: v5e:2x2
jax: 0.10.0
libtpu: 0.0.40
codegen_flags: <defaults>
</compile_context>

<pallas_src>
import math

import jax
import jax.numpy as jnp
from jax.experimental import pallas as pl
from jax.experimental.pallas import tpu as pltpu


def make_pe_table(d_model: int, max_len: int = 5000) -> jnp.ndarray:
    """Replicates PositionalEncoding.__init__ buffer: shape [max_len, d_model].

    Handles odd d_model: cos only fills floor(d/2) columns."""
    position = jnp.arange(0, max_len, dtype=jnp.float32)[:, None]            # [max_len, 1]
    div_term = jnp.exp(
        jnp.arange(0, d_model, 2, dtype=jnp.float32) * (-math.log(10000.0) / d_model)
    )                                                                         # [ceil(d/2)]
    angles = position * div_term                                              # [max_len, ceil(d/2)]
    pe = jnp.zeros((max_len, d_model), dtype=jnp.float32)
    pe = pe.at[:, 0::2].set(jnp.sin(angles))
    pe = pe.at[:, 1::2].set(jnp.cos(angles)[:, : d_model // 2])
    return pe


def _pos_enc_kernel(x_ref, pe_ref, o_ref):
    # x_ref / o_ref: (TB, TC) lane-dense tiles; pe_ref: (1, TC), broadcast over sublanes.
    o_ref[...] = x_ref[...] + pe_ref[...]


def positional_encoding(x: jnp.ndarray, pe: jnp.ndarray,
                        *, target_block_bytes: int = 2 << 20) -> jnp.ndarray:
    """x: [B, S, D], pe: [max_len, D]. Returns x + pe[:S] broadcast over batch."""
    B, S, D = x.shape
    cols = S * D
    itemsize = x.dtype.itemsize

    # Lane-dense flatten: [B, S, D] -> [B, S*D]; pe flattened the same way.
    # (pe is cast to x.dtype; for low-precision x this is a deliberate, tiny
    #  divergence from PyTorch's fp32-promoting add.)
    x2 = x.reshape(B, cols)
    pe2 = pe[:S, :].reshape(1, cols).astype(x.dtype)

    LANE = 128
    # Sublane packing multiple for this dtype: 8 (f32) / 16 (bf16) / 32 (int8/fp8).
    pack = max(8, 32 // max(1, itemsize))

    # --- batch tile: scale with B and dtype packing so small-cols shapes don't
    # collapse the block far below target_block_bytes.
    if B <= pack:
        tb = B                                   # full dim is always legal
    else:
        row_bytes = max(1, min(cols, 65536) * itemsize)
        rows_needed = max(1, target_block_bytes // row_bytes)
        tb = min(B, pl.cdiv(rows_needed, pack) * pack)   # multiple of pack, <= B
        if tb >= B:
            tb = B

    # --- column tile: multiple of 128 lanes sized so one x block ~ target_block_bytes.
    # A tc that is a multiple of 128 is legal even when it doesn't divide cols
    # (Pallas masks the ragged edge block); only cols < 128 needs the full-dim block.
    if cols >= LANE:
        tc_target = max(LANE, ((target_block_bytes // (tb * itemsize)) // LANE) * LANE)
        tc_cap = cols if cols % LANE == 0 else (cols // LANE) * LANE
        tc = min(tc_target, tc_cap)
    else:
        tc = cols                                # full dim (tiny model dim) is legal

    # --- keep >= ~8 grid steps per TensorCore (16 total after the megacore split)
    # when the shape allows it, so DMA overlap isn't lost on v7x's fast HBM; never
    # shrink the block below ~512 KiB doing so.
    MIN_STEPS = 16
    MIN_BLOCK_BYTES = 512 * 1024
    while (pl.cdiv(cols, tc) * pl.cdiv(B, tb) < MIN_STEPS
           and tc > LANE
           and tb * (tc // 2) * itemsize >= MIN_BLOCK_BYTES):
        tc = max(LANE, ((tc // 2) // LANE) * LANE)

    # Column tiles outer, batch tiles inner: pe's block index only changes on the
    # outer axis, so the pipeline re-uses the resident pe tile across batch rows.
    grid = (pl.cdiv(cols, tc), pl.cdiv(B, tb))

    # Deliberate VMEM budget: double-buffered x + out + (sublane-padded) pe, with
    # 2x headroom; capped so it fits every generation's scoped VMEM (incl. v5e/v7x).
    x_blk_bytes = tb * tc * itemsize
    pe_blk_bytes = 8 * tc * itemsize            # pe block sublane-pads 1 -> 8
    needed = 2 * (2 * x_blk_bytes) + 2 * pe_blk_bytes
    vmem_limit = int(min(32 << 20, max(8 << 20, 2 * needed)))

    cost = pl.CostEstimate(
        flops=B * cols,
        transcendentals=0,
        bytes_accessed=2 * B * cols * itemsize + cols * itemsize,
    )

    out2 = pl.pallas_call(
        _pos_enc_kernel,
        out_shape=jax.ShapeDtypeStruct((B, cols), x.dtype),
        grid_spec=pltpu.PrefetchScalarGridSpec(
            num_scalar_prefetch=0,
            grid=grid,
            in_specs=[
                pl.BlockSpec((tb, tc), lambda c, b: (b, c)),   # x tile
                pl.BlockSpec((1, tc), lambda c, b: (0, c)),    # pe tile (batch-invariant)
            ],
            out_specs=pl.BlockSpec((tb, tc), lambda c, b: (b, c)),
        ),
        compiler_params=pltpu.CompilerParams(
            # Both axes independent -> shard across both TensorCores on v7x.
            dimension_semantics=("parallel", "parallel"),
            vmem_limit_bytes=vmem_limit,
        ),
        cost_estimate=cost,
    )(x2, pe2)

    return out2.reshape(B, S, D)


if __name__ == "__main__":
    B, S, D = 2, 8, 32
    MAX_LEN = 64  # small max_len for the synthetic test; semantics identical to 5000

    key = jax.random.PRNGKey(0)
    x = jax.random.normal(key, (B, S, D), dtype=jnp.float32)

    pe = make_pe_table(D, MAX_LEN)
    # odd-d_model table builds correctly (plain-JAX shape check)
    assert make_pe_table(33, 16).shape == (16, 33)

    out = positional_encoding(x, pe)
    out = jax.block_until_ready(out)

    # Reference check (plain JAX, mirrors the PyTorch forward)
    ref = x + pe[None, :S, :]
    assert out.shape == (B, S, D)
    assert jnp.allclose(out, ref, atol=1e-6), "mismatch vs reference"

    # Extra coverage: big batch + awkward (non-multiple-of-128) cols path.
    B2, S2, D2 = 64, 10, 48                      # cols = 480, not a multiple of 128
    x2 = jax.random.normal(jax.random.PRNGKey(1), (B2, S2, D2), dtype=jnp.float32)
    pe_big = make_pe_table(D2, 32)
    out2 = jax.block_until_ready(positional_encoding(x2, pe_big))
    ref2 = x2 + pe_big[None, :S2, :]
    assert jnp.allclose(out2, ref2, atol=1e-6), "mismatch vs reference (ragged case)"

    print("KERNEL_OK")
</pallas_src>

<mosaic_0001>
module attributes {stable_mosaic.version = 11 : i64} {
  func.func @_pos_enc_kernel(%arg0: i32, %arg1: i32, %arg2: memref<2x256xf32, #tpu.memory_space<vmem>>, %arg3: memref<1x256xf32, #tpu.memory_space<vmem>>, %arg4: memref<2x256xf32, #tpu.memory_space<vmem>>) attributes {dimension_semantics = [#tpu.dimension_semantics<parallel>, #tpu.dimension_semantics<parallel>], iteration_bounds = array<i64: 1, 1>, scalar_prefetch = 0 : i64, scratch_operands = 0 : i64, tpu.core_type = #tpu.core_type<tc>, window_params = [{transform_indices = @transform_0, window_bounds = array<i64: 2, 256>}, {transform_indices = @transform_1, window_bounds = array<i64: 1, 256>}, {transform_indices = @transform_2, window_bounds = array<i64: 2, 256>}]} {
    %c0 = arith.constant 0 : index
    %c0_0 = arith.constant 0 : index
    %0 = vector.load %arg2[%c0, %c0_0] : memref<2x256xf32, #tpu.memory_space<vmem>>, vector<2x256xf32>
    %c0_1 = arith.constant 0 : index
    %c0_2 = arith.constant 0 : index
    %1 = vector.load %arg3[%c0_1, %c0_2] : memref<1x256xf32, #tpu.memory_space<vmem>>, vector<1x256xf32>
    %2 = vector.broadcast %1 : vector<1x256xf32> to vector<2x256xf32>
    %3 = arith.addf %0, %2 : vector<2x256xf32>
    %c0_3 = arith.constant 0 : index
    %c0_4 = arith.constant 0 : index
    %4 = vector.load %arg4[%c0_3, %c0_4] : memref<2x256xf32, #tpu.memory_space<vmem>>, vector<2x256xf32>
    tpu.vector_store %arg4[%c0_3, %c0_4], %3 {strides = array<i32>} : memref<2x256xf32, #tpu.memory_space<vmem>>, vector<2x256xf32>,
    return
  }
  func.func @transform_0(%arg0: i32, %arg1: i32) -> (i32, i32) {
    %c0_i32 = arith.constant 0 : i32
    return %arg1, %arg0 : i32, i32
  }
  func.func @transform_1(%arg0: i32, %arg1: i32) -> (i32, i32) {
    %c0_i32 = arith.constant 0 : i32
    %c0_i32_0 = arith.constant 0 : i32
    return %c0_i32, %arg0 : i32, i32
  }
  func.func @transform_2(%arg0: i32, %arg1: i32) -> (i32, i32) {
    %c0_i32 = arith.constant 0 : i32
    return %arg1, %arg0 : i32, i32
  }
}

</mosaic_0001>

<bundles_post_ra>
// kernel: tpu_custom_call.1
= control target key start
LH: loop header
LB: loop body
LE: loop exit
PB: predicated region body
PF: predicated region fallthrough
CT: control target
= control target key end

     0   :  { %7 = vsyncpa [#allocation3], 0  ;;  %s177_s0 = inlined_call_operand.hbm [shape: f32[2,256], index: 0, kind: input, shape index: {}]   ;;  %s178_s1 = inlined_call_operand.hbm [shape: f32[1,256], index: 1, kind: input, shape index: {}]   ;;  %s179_s2 = inlined_call_operand.hbm [shape: f32[2,256], index: 2, kind: output, shape index: {}]  }
   0x1   :  { %8 = vsyncpa [#allocation6], 0 }
   0x2   :  { %9 = vsyncpa [#allocation4], 0  ;;  %s15_s11 = sshll.u32 %s177_s0, 4  ;;  %s150_s12 = smov [#allocation2]   ;;  %s16_s11 = int_to_ptr.hbm [resolvable:$true] %s15_s11 }
   0x3   :  { %s17_s13 = sshll.u32 %s150_s12, 4  ;;  %s26_s16 = sshll.u32 %s178_s1, 4  ;;  %s18_s13 = int_to_ptr.vmem [resolvable:$true] %s17_s13  ;;  %s27_s16 = int_to_ptr.hbm [resolvable:$true] %s26_s16 }
   0x4   :  { %20 = dma.hbm_to_vmem [thread:$0]  %s16_s11, 64, %s18_s13, [#allocation3]  }
   0x5   :  { %s151_s17 = smov [#allocation5]  }
   0x6   :  { %s28_s18 = sshll.u32 %s151_s17, 4  ;;  %s29_s18 = int_to_ptr.vmem [resolvable:$true] %s28_s18 }
   0x7   :  { %31 = dma.hbm_to_vmem [thread:$0]  %s27_s16, 32, %s29_s18, [#allocation6]  }
   0x8   :  { %144 = dma.done.wait [#allocation3], 64  }
   0x9   :  { %145 = vsyncadd [#allocation3], 4294967232 }
   0xa   :  { %146 = dma.done.wait [#allocation6], 32  }
   0xb   :  { %147 = vsyncadd [#allocation6], 4294967264  ;;  %v41_v0 = vld [vmem:[#allocation5] sm:$0x3]  ;;  %vm46_vm0 = vcmask 1041408   ;;  %s152_s0 = smov [#allocation7]  }
   0xc   :  { %v43_v1 = vperm.slane %v41_v0, 0  ;;  %v44_v2 = vperm.slane %v41_v0, 1  ;;  %v40_v3 = vld [vmem:[#allocation2] sm:$0xf]  ;;  %s56_s19 = sshll.u32 %s152_s0, 4  ;;  %s58_s21 = sshll.u32 %s179_s2, 4  ;;  %s57_s19 = int_to_ptr.vmem [resolvable:$true] %s56_s19  ;;  %s59_s21 = int_to_ptr.hbm [resolvable:$true] %s58_s21 }
   0xe   :  { %v45_v4 = vrot.slane %v44_v2, 6 }
  0x10   :  { %v47_v5 = vsel %vm46_vm0, %v43_v1, %v45_v4 }
  0x11   :  { %v49_v6 = vadd.f32 %v47_v5, %v40_v3 }
  0x13   :  { %50 = vst [vmem:[#allocation7] sm:$0xf] %v49_v6 }
  0x14   :  { %61 = dma.vmem_to_hbm [thread:$0]  %s57_s19, 64, %s59_s21, [#allocation4]  }
  0x15   :  { %148 = dma.done.wait [#allocation4], 64  }
  0x16   :  { %149 = vsyncadd [#allocation4], 4294967232 }
  0x17   :  { %66 = vsyncpa [#allocation3], 1 }
  0x18   :  { %67 = vsyncpa [#allocation6], 1 }
  0x19   :  { %68 = vsyncpa [#allocation4], 1 }

</bundles_post_ra>
